<compile_context>
chip_gen: v7x
topology: tpu7x:2x2x1
jax: 0.10.0
libtpu: 0.0.40
codegen_flags: <defaults>
</compile_context>

<pallas_src>
import functools

import jax
import jax.numpy as jnp
from jax.experimental import pallas as pl
from jax.experimental.pallas import tpu as pltpu

_MIB = 1024 * 1024


def _boundary_count_kernel(labels_ref, out_ref):
    """Per-batch boundary statistics from the integer label map.

    labels_ref: (H, W) int32 VMEM block (batch dim squeezed).
    out_ref:    (2, n_classes) f32 SMEM block.
        row 0: S_i        = #(labels == i)                        (== y_sum_i)
        row 1: interior_i = #(labels == i and 3x3-cross conv == 5)
      so C_i = S_i - interior_i.  conv == 5 is only reachable where the centre
      and all four IN-BOUNDS neighbours carry the same class (zero padding
      kills the border), which the hoisted `same4 & interior` mask reproduces.
    """
    H, W = labels_ref.shape
    n_classes = out_ref.shape[1]

    labels = labels_ref[...]

    # Neighbour maps via XLU rotations.  Wrap-around rows/cols are excluded by
    # the interior mask, so circular shift == zero-padded shift here.
    up = pltpu.roll(labels, 1, 0)           # labels[r-1, c]
    down = pltpu.roll(labels, H - 1, 0)     # labels[r+1, c]
    left = pltpu.roll(labels, 1, 1)         # labels[r, c-1]
    right = pltpu.roll(labels, W - 1, 1)    # labels[r, c+1]

    rows = jax.lax.broadcasted_iota(jnp.int32, (H, W), 0)
    cols = jax.lax.broadcasted_iota(jnp.int32, (H, W), 1)
    interior = (rows >= 1) & (rows <= H - 2) & (cols >= 1) & (cols <= W - 2)

    same4 = ((labels == up) & (labels == down) &
             (labels == left) & (labels == right) & interior)
    same4_f = same4.astype(jnp.float32)     # hoisted: built once, reused per class

    def class_body(i, carry):
        t = (labels == i).astype(jnp.float32)   # one-hot slice of class i
        out_ref[0, i] = jnp.sum(t)              # S_i
        out_ref[1, i] = jnp.sum(t * same4_f)    # interior_i
        return carry

    jax.lax.fori_loop(0, n_classes, class_body, jnp.int32(0))


def _softmax_dice_kernel(logits_ref, labels_ref, out_ref, ecache_ref, *, approx):
    """Per-(batch, H-tile) softmax Dice statistics (tiles exactly, no halo).

    logits_ref: (C, TH, W) VMEM block.
    labels_ref: (TH, W) int32 VMEM block.
    out_ref:    (2, n_classes) f32 SMEM block.
        row 0: intersect_i = sum(softmax_i * onehot_i)
        row 1: z_sum_i     = sum(softmax_i ** 2)
    ecache_ref: (C, TH, W) f32 VMEM scratch caching exp(logit - channel_max).
    """
    C = logits_ref.shape[0]
    n_classes = out_ref.shape[1]
    labels = labels_ref[...]

    def _chan(c):
        # Upcast once per channel (no-op for f32 inputs; v5e has no bf16 VPU).
        return logits_ref[c].astype(jnp.float32)

    # Channel max without materializing a (C, TH, W) f32 temporary.
    m = jax.lax.fori_loop(1, C, lambda c, acc: jnp.maximum(acc, _chan(c)),
                          _chan(0))

    # Denominator pass; cache exp(logit - m) so the class loop does not repeat
    # the convert / subtract / exp per class.
    def denom_body(c, acc):
        e = jnp.exp(_chan(c) - m)
        ecache_ref[c] = e
        return acc + e

    denom = jax.lax.fori_loop(0, C, denom_body, jnp.zeros(m.shape, jnp.float32))
    inv_denom = pl.reciprocal(denom, approx=approx)   # EUP slot, effectively free

    def class_body(i, carry):
        score = ecache_ref[i] * inv_denom             # softmax channel i
        t = (labels == i).astype(jnp.float32)
        out_ref[0, i] = jnp.sum(score * t)            # intersect_i
        out_ref[1, i] = jnp.sum(score * score)        # z_sum_i
        return carry

    jax.lax.fori_loop(0, n_classes, class_body, jnp.int32(0))


def _pick_h_tile(C, H, W, itemsize, budget_bytes):
    """Largest H tile (full H, or a multiple-of-8 divisor of H) whose
    double-buffered input blocks + f32 exp cache + temporaries fit the budget."""

    def need(th):
        logits_blk = C * th * W * itemsize
        labels_blk = th * W * 4
        ecache = C * th * W * 4
        temps = 6 * th * W * 4   # m, denom, inv, score, t, slack
        return 2 * (logits_blk + labels_blk) + ecache + temps

    if need(H) <= budget_bytes:
        return H, need(H)
    cands = [t for t in range(8, H, 8) if H % t == 0 and need(t) <= budget_bytes]
    if cands:
        th = max(cands)
        return th, need(th)
    return H, need(H)   # nothing divides cleanly; fall back to full H


def boundary_dou_loss(logits, target, n_classes, *,
                      transfer_dtype=None, approx_reciprocal=True):
    """JAX/Pallas equivalent of BoundaryDoULoss(n_classes)(logits, target).

    logits: (B, C, H, W) float; target: (B, H, W) integer class indices.
    transfer_dtype: optional down-cast dtype for the logits HBM transfer.  The
      default keeps logits.dtype (a standalone f32->bf16 cast costs more HBM
      traffic than it saves unless it fuses into the producer).
    approx_reciprocal: use the EUP approximate reciprocal for the softmax
      denominator (set False for bit-closer parity with the f32 reference).
    """
    B, C, H, W = logits.shape
    assert C == n_classes, (logits.shape, n_classes)
    assert target.shape == (B, H, W), (target.shape, (B, H, W))

    logits_x = logits if transfer_dtype is None else logits.astype(transfer_dtype)
    labels_x = target if target.dtype == jnp.int32 else target.astype(jnp.int32)

    # ---- kernel 1: boundary counts (labels only, full map per batch) -------
    bvmem = int(min(48 * _MIB, max(8 * _MIB, 12 * H * W * 4)))
    bstats = pl.pallas_call(
        _boundary_count_kernel,
        out_shape=jax.ShapeDtypeStruct((B, 2, n_classes), jnp.float32),
        grid=(B,),
        in_specs=[pl.BlockSpec((None, H, W), lambda b: (b, 0, 0))],
        out_specs=pl.BlockSpec((None, 2, n_classes), lambda b: (b, 0, 0),
                               memory_space=pltpu.MemorySpace.SMEM),
        compiler_params=pltpu.CompilerParams(
            dimension_semantics=("parallel",),
            vmem_limit_bytes=bvmem),
    )(labels_x)

    # ---- kernel 2: softmax Dice stats, H-tiled exactly (no halo needed) ----
    itemsize = jnp.dtype(logits_x.dtype).itemsize
    TH, need = _pick_h_tile(C, H, W, itemsize, budget_bytes=30 * _MIB)
    nH = H // TH
    svmem = int(min(48 * _MIB, max(8 * _MIB, int(need * 1.25) + 2 * _MIB)))

    sstats = pl.pallas_call(
        functools.partial(_softmax_dice_kernel, approx=approx_reciprocal),
        out_shape=jax.ShapeDtypeStruct((B, nH, 2, n_classes), jnp.float32),
        grid=(B, nH),
        in_specs=[
            pl.BlockSpec((None, C, TH, W), lambda b, h: (b, 0, h, 0)),
            pl.BlockSpec((None, TH, W), lambda b, h: (b, h, 0)),
        ],
        out_specs=pl.BlockSpec((None, None, 2, n_classes),
                               lambda b, h: (b, h, 0, 0),
                               memory_space=pltpu.MemorySpace.SMEM),
        scratch_shapes=[pltpu.VMEM((C, TH, W), jnp.float32)],
        compiler_params=pltpu.CompilerParams(
            dimension_semantics=("parallel", "parallel"),
            vmem_limit_bytes=svmem),
    )(logits_x, labels_x)

    # ---- batch/tile reduction + tiny per-class scalar algebra (JAX glue) ---
    s_cnt = jnp.sum(bstats[:, 0, :], axis=0)               # S_i  (== y_sum_i)
    interior = jnp.sum(bstats[:, 1, :], axis=0)
    c_cnt = s_cnt - interior                                # boundary count C_i
    intersect = jnp.sum(sstats[:, :, 0, :], axis=(0, 1))
    z_sum = jnp.sum(sstats[:, :, 1, :], axis=(0, 1))
    y_sum = s_cnt

    smooth = 1e-5
    alpha = 1.0 - (c_cnt + smooth) / (s_cnt + smooth)
    alpha = 2.0 * alpha - 1.0
    alpha = jnp.minimum(alpha, 0.8)                         # min(alpha, 0.8)

    loss_per_class = (z_sum + y_sum - 2.0 * intersect + smooth) / (
        z_sum + y_sum - (1.0 + alpha) * intersect + smooth)
    return jnp.sum(loss_per_class) / n_classes


if __name__ == "__main__":
    # BoundaryDoULoss has no learnable parameters; nothing to initialize.
    n_classes = 4
    B, H, W = 2, 16, 16

    key = jax.random.PRNGKey(0)
    k_logits, k_target = jax.random.split(key)
    logits = jax.random.normal(k_logits, (B, n_classes, H, W), dtype=jnp.float32)
    target = jax.random.randint(k_target, (B, H, W), 0, n_classes, dtype=jnp.int32)

    loss = boundary_dou_loss(logits, target, n_classes)
    loss = jax.block_until_ready(loss)

    assert loss.shape == () and bool(jnp.isfinite(loss))
    print("KERNEL_OK")
</pallas_src>

<mosaic_0001>
module attributes {stable_mosaic.version = 11 : i64} {
  func.func @_boundary_count_kernel(%arg0: i32, %arg1: memref<1x16x16xi32, #tpu.memory_space<vmem>>, %arg2: memref<1x2x4xf32, #tpu.memory_space<smem>>) attributes {dimension_semantics = [#tpu.dimension_semantics<parallel>], iteration_bounds = array<i64: 2>, scalar_prefetch = 0 : i64, scratch_operands = 0 : i64, tpu.core_type = #tpu.core_type<tc>, window_params = [{transform_indices = @transform_0, window_bounds = array<i64: 1, 16, 16>}, {transform_indices = @transform_1, window_bounds = array<i64: 1, 2, 4>}]} {
    %c0 = arith.constant 0 : index
    %c0_0 = arith.constant 0 : index
    %c0_1 = arith.constant 0 : index
    %0 = vector.load %arg1[%c0, %c0_0, %c0_1] : memref<1x16x16xi32, #tpu.memory_space<vmem>>, vector<1x16x16xi32>
    %1 = vector.shape_cast %0 : vector<1x16x16xi32> to vector<16x16xi32>
    %c1_i32 = arith.constant 1 : i32
    %2 = tpu.dynamic_rotate %1 by %c1_i32 dim 0 : vector<16x16xi32>, i32 -> vector<16x16xi32>
    %c15_i32 = arith.constant 15 : i32
    %3 = tpu.dynamic_rotate %1 by %c15_i32 dim 0 : vector<16x16xi32>, i32 -> vector<16x16xi32>
    %c1_i32_2 = arith.constant 1 : i32
    %4 = tpu.dynamic_rotate %1 by %c1_i32_2 dim 1 : vector<16x16xi32>, i32 -> vector<16x16xi32>
    %c15_i32_3 = arith.constant 15 : i32
    %5 = tpu.dynamic_rotate %1 by %c15_i32_3 dim 1 : vector<16x16xi32>, i32 -> vector<16x16xi32>
    %6 = tpu.iota {dimensions = array<i32: 0>} : vector<16x16xi32>
    %7 = tpu.iota {dimensions = array<i32: 1>} : vector<16x16xi32>
    %c1_i32_4 = arith.constant 1 : i32
    %8 = vector.broadcast %c1_i32_4 : i32 to vector<16x16xi32>
    %9 = arith.cmpi sge, %6, %8 : vector<16x16xi32>
    %c14_i32 = arith.constant 14 : i32
    %10 = vector.broadcast %c14_i32 : i32 to vector<16x16xi32>
    %11 = arith.cmpi sle, %6, %10 : vector<16x16xi32>
    %12 = arith.andi %9, %11 : vector<16x16xi1>
    %c1_i32_5 = arith.constant 1 : i32
    %13 = vector.broadcast %c1_i32_5 : i32 to vector<16x16xi32>
    %14 = arith.cmpi sge, %7, %13 : vector<16x16xi32>
    %15 = arith.andi %12, %14 : vector<16x16xi1>
    %c14_i32_6 = arith.constant 14 : i32
    %16 = vector.broadcast %c14_i32_6 : i32 to vector<16x16xi32>
    %17 = arith.cmpi sle, %7, %16 : vector<16x16xi32>
    %18 = arith.andi %15, %17 : vector<16x16xi1>
    %19 = arith.cmpi eq, %1, %2 : vector<16x16xi32>
    %20 = arith.cmpi eq, %1, %3 : vector<16x16xi32>
    %21 = arith.andi %19, %20 : vector<16x16xi1>
    %22 = arith.cmpi eq, %1, %4 : vector<16x16xi32>
    %23 = arith.andi %21, %22 : vector<16x16xi1>
    %24 = arith.cmpi eq, %1, %5 : vector<16x16xi32>
    %25 = arith.andi %23, %24 : vector<16x16xi1>
    %26 = arith.andi %25, %18 : vector<16x16xi1>
    %27 = arith.extui %26 : vector<16x16xi1> to vector<16x16xi32>
    %28 = arith.sitofp %27 : vector<16x16xi32> to vector<16x16xf32>
    %c0_i32 = arith.constant 0 : i32
    %c4_i32 = arith.constant 4 : i32
    %29 = arith.addi %c0_i32, %c4_i32 : i32
    %c1_i32_7 = arith.constant 1 : i32
    scf.for %arg3 = %c0_i32 to %29 step %c1_i32_7  : i32 {
      %30 = vector.broadcast %arg3 : i32 to vector<16x16xi32>
      %31 = arith.cmpi eq, %1, %30 : vector<16x16xi32>
      %32 = arith.extui %31 : vector<16x16xi1> to vector<16x16xi32>
      %33 = arith.sitofp %32 : vector<16x16xi32> to vector<16x16xf32>
      %34 = vector.shape_cast %33 : vector<16x16xf32> to vector<1x16x16xf32>
      %cst = arith.constant dense<0.000000e+00> : vector<1xf32>
      %35 = vector.multi_reduction <add>, %34, %cst [1, 2] : vector<1x16x16xf32> to vector<1xf32>
      %36 = vector.shape_cast %35 : vector<1xf32> to vector<1x1x1xf32>
      %37 = vector.extract %36[0, 0, 0] : f32 from vector<1x1x1xf32>
      %c0_9 = arith.constant 0 : index
      %c0_10 = arith.constant 0 : index
      %38 = arith.index_cast %arg3 : i32 to index
      %39 = memref.load %arg2[%c0_9, %c0_10, %38] : memref<1x2x4xf32, #tpu.memory_space<smem>>
      memref.store %37, %arg2[%c0_9, %c0_10, %38] : memref<1x2x4xf32, #tpu.memory_space<smem>>
      %40 = arith.mulf %33, %28 : vector<16x16xf32>
      %41 = vector.shape_cast %40 : vector<16x16xf32> to vector<1x16x16xf32>
      %cst_11 = arith.constant dense<0.000000e+00> : vector<1xf32>
      %42 = vector.multi_reduction <add>, %41, %cst_11 [1, 2] : vector<1x16x16xf32> to vector<1xf32>
      %43 = vector.shape_cast %42 : vector<1xf32> to vector<1x1x1xf32>
      %44 = vector.extract %43[0, 0, 0] : f32 from vector<1x1x1xf32>
      %c0_12 = arith.constant 0 : index
      %c1 = arith.constant 1 : index
      %45 = arith.index_cast %arg3 : i32 to index
      %46 = memref.load %arg2[%c0_12, %c1, %45] : memref<1x2x4xf32, #tpu.memory_space<smem>>
      memref.store %44, %arg2[%c0_12, %c1, %45] : memref<1x2x4xf32, #tpu.memory_space<smem>>
    }
    %c4_i32_8 = arith.constant 4 : i32
    return
  }
  func.func @transform_0(%arg0: i32) -> (i32, i32, i32) {
    %c0_i32 = arith.constant 0 : i32
    %c0_i32_0 = arith.constant 0 : i32
    %c0_i32_1 = arith.constant 0 : i32
    return %arg0, %c0_i32, %c0_i32_0 : i32, i32, i32
  }
  func.func @transform_1(%arg0: i32) -> (i32, i32, i32) {
    %c0_i32 = arith.constant 0 : i32
    %c0_i32_0 = arith.constant 0 : i32
    %c0_i32_1 = arith.constant 0 : i32
    return %arg0, %c0_i32, %c0_i32_0 : i32, i32, i32
  }
}

</mosaic_0001>

<bundles_post_ra>
// kernel: tpu_custom_call.1
= control target key start
LH: loop header
LB: loop body
LE: loop exit
PB: predicated region body
PF: predicated region fallthrough
CT: control target
= control target key end

     0   :  { %6 = vsyncpa [#allocation3], 0  ;;  %s730_s0 = inlined_call_operand.hbm [shape: s32[2,16,16], index: 0, kind: input, shape index: {}]   ;;  %s731_s1 = inlined_call_operand.hbm [shape: f32[2,2,4], index: 1, kind: output, shape index: {}]  }
   0x1   :  { %8 = vsyncpa [#allocation3 + $0x1], 0 }
   0x2   :  { %9 = vsyncpa [#allocation4], 0 }
   0x3   :  { %11 = vsyncpa [#allocation4 + $0x1], 0  ;;  %s538_s6 = smov 0   ;;  %s540_s7 = smov 0  }
   0x4   :  { %s542_s8 = smov 0   ;;  %s544_s9 = smov 0  }
   0x5 LB: > { %s559_s10 = sadd.s32 4294967295, %s514_s9   ;;  %s349_s11 = sadd.s32 4294967294, %s514_s9   ;;  %s514_s9 = sphi %s544_s9, %s746_s9   ;;  %s510_s8 = sphi %s542_s8, %s745_s8   ;;  %s506_s7 = sphi %s540_s7, %s744_s7   ;;  %s502_s6 = sphi %s538_s6, %s743_s6  }
   0x6   : > { %s563_s12 = sadd.s32 1, %s514_s9   ;;  %s24_s13 = sadd.s32 1, %s510_s8 }
   0x7   : > { %s21_s14 = ssub.s32 %s514_s9, %s563_s12  ;;  %p31_p0 = scmp.ne.s32.totalorder %s510_s8, %s506_s7 }
   0x8   : > { %p22_p1 = scmp.eq.s32.totalorder %s21_s14, 0  ;;  %p32_p2 = scmp.eq.s32.totalorder %s514_s9, 0 }
   0x9   : > { %p37_p3 = scmp.ne.s32.totalorder %s506_s7, %s502_s6  ;;  %p38_p4 = scmp.eq.s32.totalorder %s559_s10, 0 }
   0xa   : > { %s575_s15 = scalar_select %p22_p1, %s510_s8, %s24_s13  }
   0xb   : > { %p577_p5 = por %p32_p2, %p31_p0  ;;  %p581_p6 = por %p38_p4, %p37_p3 }
   0xc   : > { %p61_p7 = scmp.eq.s32.totalorder %s559_s10, 1  ;;  %p67_p8 = scmp.eq.s32.totalorder %s349_s11, 1 }
   0xd   : > { %p732_p9 = scmp.lt.s32.totalorder %s514_s9, 2  ;;  %s87_s20 = sand.u32 1, %s510_s8  }
   0xe   : > { %p587_p10 = por %p61_p7, %p31_p0  ;;  %p591_p11 = por %p67_p8, %p37_p3 }
   0xf   : > { %s367_s21 = sshll.u32 %s514_s9, 8  ;;  %s352_s22 = sshll.u32 %s87_s20, 4 }
  0x10   : > { %s737_s18 = scalar_select %p587_p10, 1, 0 }
  0x11   : > { %s738_s19 = scalar_select %p591_p11, 1, 0 }
  0x12   : > { %s600_s25 = scalar_lea.hbm %s730_s0, %s367_s21  ;;  %s91_s26 = scalar_lea.vmem [#allocation2], %s352_s22 }
  0x13   : > { %s98_s27 = sshll.u32 %s91_s26, 4  ;;  %p606_p12 = pnand %p732_p9, %p577_p5  ;;  %s610_s27 = int_to_ptr.vmem [resolvable:$true] %s98_s27 }
  0x14   : > { %s612_s29 = scalar_lea.sflag [#allocation3], %s87_s20  ;;  %s428_s30 = scalar_lea.hbm %s600_s25, 256 }
  0x15   : > { %p429_p13 = scmp.ne.s32.totalorder %s600_s25, %s428_s30  ;;  %p430_p0 = pneg %p606_p12 }
  0x16   : > { %s433_s4 = scalar_lea.hbm %s730_s0, 512  ;;  %p434_p3 = scmp.lt.u32.totalorder %s600_s25, %s730_s0 }
  0x17   : > { %p431_p1 = pnand %p430_p0, %p429_p13  ;;  %p435_p4 = scmp.lt.u32.totalorder %s433_s4, %s428_s30 }
  0x18   : > { %p437_p7 = scmp.lt.u32.totalorder %s428_s30, %s600_s25 }
  0x19   : > { %p432_p2 = pneg %p431_p1  ;;  %p436_p5 = por %p435_p4, %p434_p3 }
  0x1b   : > { %p438_p8 = por %p437_p7, %p436_p5 }
  0x1d   : > { %p439_p9 = pnand %p438_p8, %p432_p2 }
  0x1f   : > { %442 = shalt.err (!%p439_p9)
}
  0x20   : > { %s443_s13 = scalar_lea.vmem %s610_s27, 256  ;;  %s520_s14 = smov [#allocation2]  }
  0x21   : > { %p444_p13 = scmp.ne.s32.totalorder %s610_s27, %s443_s13  ;;  %s448_s16 = sshll.u32 %s520_s14, 4  ;;  %s449_s16 = int_to_ptr.vmem [resolvable:$false] %s448_s16 }
  0x22   : > { %s450_s20 = scalar_lea.vmem %s449_s16, 512  ;;  %p451_p10 = scmp.lt.s32.totalorder %s610_s27, %s449_s16 }
  0x23   : > { %p446_p1 = pnand %p444_p13, %p430_p0  ;;  %p452_p3 = scmp.lt.s32.totalorder %s450_s20, %s443_s13 }
  0x25   : > { %p447_p11 = pneg %p446_p1  ;;  %p453_p4 = por %p452_p3, %p451_p10 }
  0x27   : > { %p454_p5 = pnand %p453_p4, %p447_p11 }
  0x29   : > { %457 = shalt.err (!%p454_p5)
}
  0x2a   : > { %s521_s21 = smov 128   ;;  %s522_s22 = smov 8  }
  0x2b   : > { %379 = dma.hbm_to_vmem [thread:$0]  (!%p606_p12), %s600_s25, 256, %s610_s27, %s612_s29, %s521_s21, %s521_s21, %s522_s22  }
  0x2c   : > { %p355_p9 = scmp.ge.s32.totalorder %s514_s9, 1  ;;  %p106_p0 = scmp.lt.s32.totalorder %s514_s9, 3 }
  0x2e   : > { %p107_p2 = pnand %p355_p9, %p106_p0 }
  0x2f   : > { %s643_s23 = sand.u32 (!%p107_p2), 1, %s506_s7  }
  0x30   : > { %110 = sbr.rel (%p107_p2) target bundleno = 633 (0x279), region = 24  ;;  %s356_s24 = sshll.u32 (!%p107_p2), %s643_s23, 4 }
  0x31   : > { %s113_s26 = scalar_lea.sflag (!%p107_p2), [#allocation3], %s643_s23  ;;  %s116_s30 = scalar_lea.vmem (!%p107_p2), [#allocation2], %s356_s24 }
  0x37   : > { %493 = dma.done.wait (%p581_p6), %s113_s26, 256  }
  0x38   : > { %495 = vsyncadd (%p581_p6), %s113_s26, 4294967040  ;;  %v651_v0 = vld [vmem:[%s116_s30] sm:$0xff]  ;;  %s523_s25 = smov 16   ;;  %v654_v1 = vld [vmem:[%s116_s30 + $0x8] sm:$0xff]  ;;  %vm149_vm0 = vcmask 1047680   ;;  %s357_s17 = sshll.u32 %s643_s23, 8  ;;  %v139_v10 = vlaneseq }
  0x39   : > { %150 = vrot.lane.b32.xlu0 %v651_v0, %s523_s25  ;;  %s524_s27 = smov 113   ;;  %s525_s28 = smov 127   ;;  %v138_v12 = vrot.slane %v654_v1, 7  ;;  %v145_v13 = vrot.slane %v654_v1, 1  ;;  %v137_v14 = vrot.slane %v651_v0, 7  ;;  %v144_v15 = vrot.slane %v651_v0, 1 }
  0x3a   : > { %v140_v11 = vshrl.u32 %v139_v10, 7  ;;  %v164_v18 = vand.u32 127, %v139_v10  ;;  %v526_v26 = vmov 0.0   ;;  %s676_s29 = scalar_lea.smem [#allocation5], %s357_s17  ;;  %s678_s2 = smov 0  }
  0x3c   : > { %vm141_vm1 = vcmp.lt.s32.totalorder %v140_v11, 1  ;;  %vm146_vm2 = vcmp.lt.s32.totalorder %v140_v11, 7  ;;  %v162_v19 = vadd.s32 8, %v140_v11  ;;  %vm165_vm5 = vcmp.ge.s32.totalorder %v140_v11, 1 }
  0x3d   : > { %153 = vrot.lane.b32.xlu0 %v654_v1, %s523_s25  ;;  %v143_v16 = vsel %vm141_vm1, %v138_v12, %v137_v14  ;;  %v147_v17 = vsel %vm146_vm2, %v144_v15, %v145_v13  ;;  %v142_v20 = vsel %vm141_vm1, %v137_v14, %v138_v12  ;;  %v148_v21 = vsel %vm146_vm2, %v145_v13, %v144_v15 }
  0x3e   : > { %vm177_vm3 = vcmp.eq.s32.totalorder %v651_v0, %v143_v16  ;;  %vm179_vm4 = vcmp.eq.s32.totalorder %v651_v0, %v147_v17  ;;  %vm171_vm6 = vcmp.ge.s32.totalorder %v164_v18, 1  ;;  %vm168_vm7 = vcmp.le.s32.totalorder %v162_v19, 14 }
  0x3f   : > { %vm181_vm8 = vmand %vm177_vm3, %vm179_vm4  ;;  %vm178_vm9 = vcmp.eq.s32.totalorder %v654_v1, %v142_v20  ;;  %vm180_vm10 = vcmp.eq.s32.totalorder %v654_v1, %v148_v21  ;;  %vm174_vm12 = vcmp.le.s32.totalorder %v164_v18, 14 }
  0x40   : > { %vm172_vm11 = vmand %vm165_vm5, %vm171_vm6 }
  0x41   : > { %vm173_vm13 = vmand %vm168_vm7, %vm171_vm6 }
  0x42   : > { %vm182_vm15 = vmand %vm178_vm9, %vm180_vm10 }
  0x43   : > { %vm176_vm2 = vmand %vm173_vm13, %vm174_vm12 }
  0xab   : > { %v151_v2 = vpop.permute.xlu0 %150 }
  0xac   : > { %v152_v3 = vsel %vm149_vm0, %v151_v2, %v651_v0 }
  0xad   : > { %156 = vrot.lane.b32.xlu1 %v152_v3, %s523_s25 }
  0xaf   : > { %v154_v4 = vpop.permute.xlu0 %153 }
  0xb0   : > { %v155_v5 = vsel %vm149_vm0, %v154_v4, %v654_v1 }
  0xb1   : > { %158 = vrot.lane.b32.xlu1 %v155_v5, %s523_s25 }
 0x11f   : > { %v157_v6 = vpop.permute.xlu1 %156 }
 0x120   : > { %v160_v7 = vsel %vm149_vm0, %v157_v6, %v651_v0 }
 0x121   : > { %183 = vrot.lane.b32.xlu0 %v160_v7, %s524_s27 }
 0x123   : > { %v159_v8 = vpop.permute.xlu1 %158 }
 0x124   : > { %v161_v9 = vsel %vm149_vm0, %v159_v8, %v654_v1  ;;  %vm175_vm0 = vmand %vm172_vm11, %vm174_vm12 }
 0x125   : > { %191 = vrot.lane.b32.xlu0 %v160_v7, %s525_s28  ;;  %185 = vrot.lane.b32.xlu1 %v161_v9, %s524_s27 }
 0x129   : > { %193 = vrot.lane.b32.xlu1 %v161_v9, %s525_s28 }
 0x193   : > { %v184_v22 = vpop.permute.xlu0 %183 }
 0x194   : > { %vm187_vm14 = vcmp.eq.s32.totalorder %v651_v0, %v184_v22 }
 0x195   : > { %vm189_vm3 = vmand %vm181_vm8, %vm187_vm14 }
 0x197   : > { %v186_v23 = vpop.permute.xlu1 %185  ;;  %v192_v24 = vpop.permute.xlu0 %191 }
 0x198   : > { %vm195_vm1 = vcmp.eq.s32.totalorder %v651_v0, %v192_v24  ;;  %vm188_vm4 = vcmp.eq.s32.totalorder %v654_v1, %v186_v23 }
 0x199   : > { %vm197_vm5 = vmand %vm189_vm3, %vm195_vm1 }
 0x19a   : > { %vm199_vm6 = vmand %vm197_vm5, %vm175_vm0 }
 0x19b   : > { %v194_v25 = vpop.permute.xlu1 %193  ;;  %vm190_vm7 = vmand %vm182_vm15, %vm188_vm4  ;;  %v358_v27 = vsel %vm199_vm6, 1.0, %v526_v26 }
 0x19c   : > { %vm196_vm9 = vcmp.eq.s32.totalorder %v654_v1, %v194_v25 }
 0x19d   : > { %vm198_vm10 = vmand %vm190_vm7, %vm196_vm9 }
 0x19e   : > { %vm200_vm11 = vmand %vm198_vm10, %vm176_vm2 }
 0x19f   : > { %v359_v28 = vsel %vm200_vm11, 1.0, %v526_v26 }
 0x1a0 LB: >> { %v211_v29 = vstv %s518_s2  ;;  %vm218_vm8 = vcmask 130048   ;;  %v527_v30 = vmov 0.0   ;;  %s247_s3 = sshra.s32 %s518_s2, 7  ;;  %s252_s4 = sand.u32 127, %s518_s2  ;;  %s518_s2 = sphi %s678_s2, %s210_s2  }
 0x1a1   : >> { %vm212_vm12 = vcmp.eq.s32.totalorder %v651_v0, %v211_v29  ;;  %vm213_vm13 = vcmp.eq.s32.totalorder %v654_v1, %v211_v29  ;;  %s362_s5 = sshll.u32 %s247_s3, 7  ;;  %s231_s13 = scalar_lea.smem %s676_s29, %s518_s2 [#allocation5] }
 0x1a2   : >> { %v360_v31 = vsel %vm212_vm12, 1.0, %v527_v30  ;;  %v361_v32 = vsel %vm213_vm13, 1.0, %v527_v30  ;;  %s309_s11 = sadd.s32 %s362_s5, %s252_s4  ;;  %s210_s2 = sadd.s32 1, %s518_s2  }
 0x1a3   : >> { %v219_v33 = vsel %vm218_vm8, %v360_v31, 0.0  ;;  %v220_v34 = vsel %vm218_vm8, %v361_v32, 0.0  ;;  %v233_v35 = vmul.f32 %v360_v31, %v358_v27  ;;  %v234_v36 = vmul.f32 %v361_v32, %v359_v28  ;;  %s310_s14 = scalar_lea.smem %s676_s29, %s309_s11 [#allocation5]  ;;  %p207_p6 = scmp.ge.s32.totalorder %s210_s2, 4  }
 0x1a4   : >> { %v221_v37 = vadd.f32 %v220_v34, %v219_v33  ;;  %s311_s20 = scalar_lea.smem %s310_s14, 128 [#allocation5]  ;;  %s364_s22 = sshll.u32 (%p207_p6), %s559_s10, 5 }
 0x1a5   : >> { %v235_v38 = vsel %vm218_vm8, %v233_v35, 0.0  ;;  %v236_v39 = vsel %vm218_vm8, %v234_v36, 0.0  ;;  %s268_s30 = scalar_lea.hbm (%p207_p6), %s731_s1, %s364_s22  ;;  %s257_s25 = scalar_lea.sflag (%p207_p6), [#allocation4], %s643_s23 }
 0x1a6   : >> { %222 = vadd.xlane.f32.xlu0 %v221_v37  ;;  %v237_v40 = vadd.f32 %v236_v39, %v235_v38  ;;  %s458_s17 = scalar_lea.hbm (%p207_p6), %s268_s30, 32  ;;  %p740_p11 = scmp.ne.s32.totalorder (%p207_p6), %s737_s18, 0 }
 0x1a7   : > { %p459_p10 = scmp.ne.s32.totalorder (%p207_p6), %s268_s30, %s458_s17  ;;  %s462_s3 = scalar_lea.hbm (%p207_p6), %s731_s1, 64 }
 0x1a8   : > { %p463_p8 = scmp.lt.u32.totalorder (%p207_p6), %s268_s30, %s731_s1  ;;  %p464_p13 = scmp.lt.u32.totalorder (%p207_p6), %s462_s3, %s458_s17 }
 0x1a9   : > { %p460_p12 = pnand (%p207_p6), %p459_p10, %p740_p11  ;;  %p466_p3 = scmp.lt.u32.totalorder (%p207_p6), %s458_s17, %s268_s30 }
 0x1aa   : >> { %238 = vadd.xlane.f32.xlu0 %v237_v40  ;;  %p465_p1 = por (%p207_p6), %p464_p13, %p463_p8 }
 0x1ab   : > { %p461_p7 = pneg (%p207_p6), %p460_p12 }
 0x1ac   : > { %p467_p4 = por (%p207_p6), %p466_p3, %p465_p1 }
 0x1ae   : > { %p468_p5 = pnand (%p207_p6), %p467_p4, %p461_p7 }
 0x233   : >> { %v223_v41 = vpop.xlane.xlu0 %222 }
 0x234   : >> { %v224_v42 = vrot.slane %v223_v41, 4 }
 0x236   : >> { %v225_v43 = vadd.f32 %v224_v42, %v223_v41 }
 0x237   : >> { %v239_v44 = vpop.xlane.xlu0 %238 }
 0x238   : >> { %v226_v45 = vrot.slane %v225_v43, 2  ;;  %v240_v46 = vrot.slane %v239_v44, 4 }
 0x23a   : >> { %v241_v47 = vadd.f32 %v240_v46, %v239_v44  ;;  %v227_v48 = vadd.f32 %v226_v45, %v225_v43 }
 0x23c   : >> { %v242_v49 = vrot.slane %v241_v47, 2  ;;  %v228_v50 = vrot.slane %v227_v48, 1 }
 0x23e   : >> { %v243_v51 = vadd.f32 %v242_v49, %v241_v47  ;;  %v229_v52 = vadd.f32 %v228_v50, %v227_v48 }
 0x240   : >> { %368 = vpush %v229_v52  ;;  %v244_v53 = vrot.slane %v243_v51, 1 }
 0x242   : >> { %v245_v54 = vadd.f32 %v244_v53, %v243_v51 }
 0x244   : >> { %370 = vpush %v245_v54 }
 0x270   : > { %209 = sbr.rel (!%p207_p6) target bundleno = 416 (0x1a0), region = 78 }
 0x271   : >> { %s369_s16 = spop %368 }
 0x272   : >> { %232 = sst [smem:[%s231_s13]] %s369_s16 }
 0x275   : >> { %s371_s21 = spop %370 }
 0x276   : >> { %255 = sst [smem:[%s311_s20]] %s371_s21 }
 0x277   : > { %471 = shalt.err (!%p468_p5)
}
 0x278   : > { %374 = dma.smem_to_hbm (%p740_p11), %s676_s29, 32, %s268_s30, %s257_s25  }
 0x279 PF: > { %p741_p9 = scmp.lt.s32.totalorder %s514_s9, 2 }
 0x27a   : > { %s280_s10 = sand.u32 (!%p741_p9), 1, %s502_s6   ;;  %p742_p0 = scmp.ne.s32.totalorder (!%p741_p9), %s738_s19, 0 }
 0x27b   : > { %275 = sbr.rel (%p741_p9) target bundleno = 645 (0x285), region = 43  ;;  %s281_s23 = scalar_lea.sflag (!%p741_p9), [#allocation4], %s280_s10 }
 0x282   : > { %497 = dma.done.wait (%p742_p0), %s281_s23, 32  }
 0x283   : > { %499 = vsyncadd (%p742_p0), %s281_s23, 4294967264 }
 0x284   : > { %286 = sfence }
 0x285 PF: > { %p14_p2 = scmp.ge.s32.totalorder %s563_s12, 4   ;;  %s743_s6 = smov %s506_s7 }
 0x286   : > { %s744_s7 = smov %s510_s8  ;;  %s745_s8 = smov %s575_s15 }
 0x287   : > { %s746_s9 = smov %s563_s12  ;;  %16 = sbr.rel (!%p14_p2) target bundleno = 5 (0x5), region = 89 }
 0x28e   :  { %287 = vsyncpa [#allocation3], 1 }
 0x28f   :  { %289 = vsyncpa [#allocation3 + $0x1], 1 }
 0x290   :  { %290 = vsyncpa [#allocation4], 1 }
 0x291   :  { %292 = vsyncpa [#allocation4 + $0x1], 1 }

</bundles_post_ra>
